<compile_context>
chip_gen: v7x
topology: tpu7x:2x2x1
jax: 0.10.0
libtpu: 0.0.40
codegen_flags: <defaults>
</compile_context>

<pallas_src>
import jax
import jax.numpy as jnp
from jax.experimental import pallas as pl
from jax.experimental.pallas import tpu as pltpu

_LANE = 128
_SUBLANE = 8


def _round_up(x, m):
    return ((x + m - 1) // m) * m


def _confidence_loss_kernel(synth_ref, target_ref, predict_ref, map_ref, conf_ref):
    # synth_ref/target_ref: (1, C, TR, 128); predict_ref: (1, TR, 128)
    # map_ref/conf_ref:     (1, 8, 128) per-batch partial sums, resident across
    #                       the HW-tile ("arbitrary") grid axis.
    t = pl.program_id(1)

    @pl.when(t == 0)
    def _():
        map_ref[...] = jnp.zeros_like(map_ref)
        conf_ref[...] = jnp.zeros_like(conf_ref)

    num_ch = synth_ref.shape[1]

    # Channel-accumulated difference: keep only one (TR, 128) f32 plane live.
    diff = synth_ref[0, 0].astype(jnp.float32) - target_ref[0, 0].astype(jnp.float32)
    for c in range(1, num_ch):
        diff = diff + (
            synth_ref[0, c].astype(jnp.float32) - target_ref[0, c].astype(jnp.float32)
        )

    conf = jnp.abs(predict_ref[0].astype(jnp.float32))  # (TR, 128)
    m = jnp.abs(diff) * conf                            # (TR, 128)

    tr = conf.shape[0]  # multiple of 8 by construction
    # Fold rows TR -> 8 with elementwise vreg adds (leading-axis reduce, no XLU).
    m8 = jnp.sum(m.reshape(tr // _SUBLANE, _SUBLANE, _LANE), axis=0)
    c8 = jnp.sum(conf.reshape(tr // _SUBLANE, _SUBLANE, _LANE), axis=0)

    map_ref[...] = map_ref[...] + m8[None, :, :]
    conf_ref[...] = conf_ref[...] + c8[None, :, :]


def confidence_loss(synth, target, predict, *, max_tile_elems=32 * 1024):
    """synth/target: (B, C, H, W); predict: (B, 1, H, W). Returns scalar f32 loss.

    max_tile_elems is the number of H*W elements processed per grid step
    (multiple of 1024). Default keeps the double-buffered working set at a few
    MiB, safe for v5e/v6e (128 MiB VMEM) and v7x (64 MiB VMEM).
    """
    B, C, H, W = synth.shape
    assert target.shape == (B, C, H, W)
    assert predict.shape == (B, 1, H, W)  # PyTorch .view requires 1 channel

    hw = H * W
    min_tile = _SUBLANE * _LANE  # 1024

    tile = min(_round_up(hw, min_tile), _round_up(max_tile_elems, min_tile))
    hw_pad = _round_up(hw, tile)
    num_tiles = hw_pad // tile
    tr = tile // _LANE  # rows per tile, multiple of 8

    # Lane-dense layout: flatten H*W, zero-pad, fold into (rows, 128).
    def to_rows(x, ch):
        x = x.reshape(B, ch, hw)
        if hw_pad != hw:
            x = jnp.pad(x, ((0, 0), (0, 0), (0, hw_pad - hw)))
        return x.reshape(B, ch, hw_pad // _LANE, _LANE)

    synth_r = to_rows(synth, C)
    target_r = to_rows(target, C)
    predict_r = to_rows(predict, 1)[:, 0]  # (B, hw_pad//128, 128)

    map_part, conf_part = pl.pallas_call(
        _confidence_loss_kernel,
        out_shape=(
            jax.ShapeDtypeStruct((B, _SUBLANE, _LANE), jnp.float32),
            jax.ShapeDtypeStruct((B, _SUBLANE, _LANE), jnp.float32),
        ),
        grid_spec=pltpu.PrefetchScalarGridSpec(
            num_scalar_prefetch=0,
            grid=(B, num_tiles),
            in_specs=[
                pl.BlockSpec((1, C, tr, _LANE), lambda b, t: (b, 0, t, 0)),
                pl.BlockSpec((1, C, tr, _LANE), lambda b, t: (b, 0, t, 0)),
                pl.BlockSpec((1, tr, _LANE), lambda b, t: (b, t, 0)),
            ],
            out_specs=[
                pl.BlockSpec((1, _SUBLANE, _LANE), lambda b, t: (b, 0, 0)),
                pl.BlockSpec((1, _SUBLANE, _LANE), lambda b, t: (b, 0, 0)),
            ],
        ),
        compiler_params=pltpu.CompilerParams(
            # batch axis shardable across TCs (v7x megacore); HW-tile axis is the
            # reduction axis (output resident), so it must be "arbitrary".
            dimension_semantics=("parallel", "arbitrary"),
            vmem_limit_bytes=32 * 1024 * 1024,
        ),
    )(synth_r, target_r, predict_r)

    # Final tiny reduction + division + sum over batch in plain JAX.
    map_sum = jnp.sum(map_part.reshape(B, -1), axis=1)
    conf_sum = jnp.sum(conf_part.reshape(B, -1), axis=1)
    return jnp.sum(map_sum / conf_sum)


def _reference(synth, target, predict):
    B, _, H, W = predict.shape
    confidence = jnp.abs(predict).reshape(B, H, W)
    difference = jnp.sum(synth - target, axis=1)
    map_ = jnp.abs(difference) * confidence
    conf_sum = jnp.sum(confidence.reshape(B, -1), axis=1)
    map_sum = jnp.sum(map_.reshape(B, -1), axis=1)
    return jnp.sum(map_sum / conf_sum)


if __name__ == "__main__":
    key = jax.random.PRNGKey(0)
    k1, k2, k3 = jax.random.split(key, 3)

    B, C, H, W = 2, 4, 16, 16
    synth = jax.random.normal(k1, (B, C, H, W), dtype=jnp.float32)
    target = jax.random.normal(k2, (B, C, H, W), dtype=jnp.float32)
    predict = jax.random.normal(k3, (B, 1, H, W), dtype=jnp.float32)

    loss = confidence_loss(synth, target, predict)
    jax.block_until_ready(loss)

    ref = _reference(synth, target, predict)
    assert jnp.allclose(loss, ref, rtol=1e-5, atol=1e-5), (loss, ref)

    print("KERNEL_OK")
</pallas_src>

<mosaic_0001>
module attributes {stable_mosaic.version = 11 : i64} {
  func.func @_confidence_loss_kernel(%arg0: i32, %arg1: i32, %arg2: memref<1x4x8x128xf32, #tpu.memory_space<vmem>>, %arg3: memref<1x4x8x128xf32, #tpu.memory_space<vmem>>, %arg4: memref<1x8x128xf32, #tpu.memory_space<vmem>>, %arg5: memref<1x8x128xf32, #tpu.memory_space<vmem>>, %arg6: memref<1x8x128xf32, #tpu.memory_space<vmem>>) attributes {dimension_semantics = [#tpu.dimension_semantics<parallel>, #tpu.dimension_semantics<arbitrary>], iteration_bounds = array<i64: 2, 1>, scalar_prefetch = 0 : i64, scratch_operands = 0 : i64, tpu.core_type = #tpu.core_type<tc>, window_params = [{transform_indices = @transform_0, window_bounds = array<i64: 1, 4, 8, 128>}, {transform_indices = @transform_1, window_bounds = array<i64: 1, 4, 8, 128>}, {transform_indices = @transform_2, window_bounds = array<i64: 1, 8, 128>}, {transform_indices = @transform_3, window_bounds = array<i64: 1, 8, 128>}, {transform_indices = @transform_4, window_bounds = array<i64: 1, 8, 128>}]} {
    %c0_i32 = arith.constant 0 : i32
    %0 = arith.cmpi eq, %arg1, %c0_i32 : i32
    %1 = arith.extui %0 : i1 to i32
    %c0_i32_0 = arith.constant 0 : i32
    %2 = arith.cmpi ne, %1, %c0_i32_0 : i32
    scf.if %2 {
      %cst_45 = arith.constant 0.000000e+00 : f32
      %43 = vector.broadcast %cst_45 : f32 to vector<1x8x128xf32>
      %c0_46 = arith.constant 0 : index
      %c0_47 = arith.constant 0 : index
      %c0_48 = arith.constant 0 : index
      %44 = vector.load %arg5[%c0_46, %c0_47, %c0_48] : memref<1x8x128xf32, #tpu.memory_space<vmem>>, vector<1x8x128xf32>
      tpu.vector_store %arg5[%c0_46, %c0_47, %c0_48], %43 {strides = array<i32>} : memref<1x8x128xf32, #tpu.memory_space<vmem>>, vector<1x8x128xf32>,
      %cst_49 = arith.constant 0.000000e+00 : f32
      %45 = vector.broadcast %cst_49 : f32 to vector<1x8x128xf32>
      %c0_50 = arith.constant 0 : index
      %c0_51 = arith.constant 0 : index
      %c0_52 = arith.constant 0 : index
      %46 = vector.load %arg6[%c0_50, %c0_51, %c0_52] : memref<1x8x128xf32, #tpu.memory_space<vmem>>, vector<1x8x128xf32>
      tpu.vector_store %arg6[%c0_50, %c0_51, %c0_52], %45 {strides = array<i32>} : memref<1x8x128xf32, #tpu.memory_space<vmem>>, vector<1x8x128xf32>,
    } else {
    }
    %c0 = arith.constant 0 : index
    %c0_1 = arith.constant 0 : index
    %c0_2 = arith.constant 0 : index
    %c0_3 = arith.constant 0 : index
    %3 = vector.load %arg2[%c0, %c0_1, %c0_2, %c0_3] : memref<1x4x8x128xf32, #tpu.memory_space<vmem>>, vector<1x1x8x128xf32>
    %4 = vector.shape_cast %3 : vector<1x1x8x128xf32> to vector<8x128xf32>
    %c0_4 = arith.constant 0 : index
    %c0_5 = arith.constant 0 : index
    %c0_6 = arith.constant 0 : index
    %c0_7 = arith.constant 0 : index
    %5 = vector.load %arg3[%c0_4, %c0_5, %c0_6, %c0_7] : memref<1x4x8x128xf32, #tpu.memory_space<vmem>>, vector<1x1x8x128xf32>
    %6 = vector.shape_cast %5 : vector<1x1x8x128xf32> to vector<8x128xf32>
    %7 = arith.subf %4, %6 : vector<8x128xf32>
    %c0_8 = arith.constant 0 : index
    %c1 = arith.constant 1 : index
    %c0_9 = arith.constant 0 : index
    %c0_10 = arith.constant 0 : index
    %8 = vector.load %arg2[%c0_8, %c1, %c0_9, %c0_10] : memref<1x4x8x128xf32, #tpu.memory_space<vmem>>, vector<1x1x8x128xf32>
    %9 = vector.shape_cast %8 : vector<1x1x8x128xf32> to vector<8x128xf32>
    %c0_11 = arith.constant 0 : index
    %c1_12 = arith.constant 1 : index
    %c0_13 = arith.constant 0 : index
    %c0_14 = arith.constant 0 : index
    %10 = vector.load %arg3[%c0_11, %c1_12, %c0_13, %c0_14] : memref<1x4x8x128xf32, #tpu.memory_space<vmem>>, vector<1x1x8x128xf32>
    %11 = vector.shape_cast %10 : vector<1x1x8x128xf32> to vector<8x128xf32>
    %12 = arith.subf %9, %11 : vector<8x128xf32>
    %13 = arith.addf %7, %12 : vector<8x128xf32>
    %c0_15 = arith.constant 0 : index
    %c2 = arith.constant 2 : index
    %c0_16 = arith.constant 0 : index
    %c0_17 = arith.constant 0 : index
    %14 = vector.load %arg2[%c0_15, %c2, %c0_16, %c0_17] : memref<1x4x8x128xf32, #tpu.memory_space<vmem>>, vector<1x1x8x128xf32>
    %15 = vector.shape_cast %14 : vector<1x1x8x128xf32> to vector<8x128xf32>
    %c0_18 = arith.constant 0 : index
    %c2_19 = arith.constant 2 : index
    %c0_20 = arith.constant 0 : index
    %c0_21 = arith.constant 0 : index
    %16 = vector.load %arg3[%c0_18, %c2_19, %c0_20, %c0_21] : memref<1x4x8x128xf32, #tpu.memory_space<vmem>>, vector<1x1x8x128xf32>
    %17 = vector.shape_cast %16 : vector<1x1x8x128xf32> to vector<8x128xf32>
    %18 = arith.subf %15, %17 : vector<8x128xf32>
    %19 = arith.addf %13, %18 : vector<8x128xf32>
    %c0_22 = arith.constant 0 : index
    %c3 = arith.constant 3 : index
    %c0_23 = arith.constant 0 : index
    %c0_24 = arith.constant 0 : index
    %20 = vector.load %arg2[%c0_22, %c3, %c0_23, %c0_24] : memref<1x4x8x128xf32, #tpu.memory_space<vmem>>, vector<1x1x8x128xf32>
    %21 = vector.shape_cast %20 : vector<1x1x8x128xf32> to vector<8x128xf32>
    %c0_25 = arith.constant 0 : index
    %c3_26 = arith.constant 3 : index
    %c0_27 = arith.constant 0 : index
    %c0_28 = arith.constant 0 : index
    %22 = vector.load %arg3[%c0_25, %c3_26, %c0_27, %c0_28] : memref<1x4x8x128xf32, #tpu.memory_space<vmem>>, vector<1x1x8x128xf32>
    %23 = vector.shape_cast %22 : vector<1x1x8x128xf32> to vector<8x128xf32>
    %24 = arith.subf %21, %23 : vector<8x128xf32>
    %25 = arith.addf %19, %24 : vector<8x128xf32>
    %c0_29 = arith.constant 0 : index
    %c0_30 = arith.constant 0 : index
    %c0_31 = arith.constant 0 : index
    %26 = vector.load %arg4[%c0_29, %c0_30, %c0_31] : memref<1x8x128xf32, #tpu.memory_space<vmem>>, vector<1x8x128xf32>
    %27 = vector.shape_cast %26 : vector<1x8x128xf32> to vector<8x128xf32>
    %28 = math.absf %27 : vector<8x128xf32>
    %29 = math.absf %25 : vector<8x128xf32>
    %30 = arith.mulf %29, %28 : vector<8x128xf32>
    %31 = vector.shape_cast %30 : vector<8x128xf32> to vector<1x8x128xf32>
    %cst = arith.constant dense<0.000000e+00> : vector<8x128xf32>
    %32 = vector.multi_reduction <add>, %31, %cst [0] : vector<1x8x128xf32> to vector<8x128xf32>
    %33 = vector.shape_cast %28 : vector<8x128xf32> to vector<1x8x128xf32>
    %cst_32 = arith.constant dense<0.000000e+00> : vector<8x128xf32>
    %34 = vector.multi_reduction <add>, %33, %cst_32 [0] : vector<1x8x128xf32> to vector<8x128xf32>
    %c0_33 = arith.constant 0 : index
    %c0_34 = arith.constant 0 : index
    %c0_35 = arith.constant 0 : index
    %35 = vector.load %arg5[%c0_33, %c0_34, %c0_35] : memref<1x8x128xf32, #tpu.memory_space<vmem>>, vector<1x8x128xf32>
    %36 = vector.shape_cast %32 : vector<8x128xf32> to vector<1x8x128xf32>
    %37 = arith.addf %35, %36 : vector<1x8x128xf32>
    %c0_36 = arith.constant 0 : index
    %c0_37 = arith.constant 0 : index
    %c0_38 = arith.constant 0 : index
    %38 = vector.load %arg5[%c0_36, %c0_37, %c0_38] : memref<1x8x128xf32, #tpu.memory_space<vmem>>, vector<1x8x128xf32>
    tpu.vector_store %arg5[%c0_36, %c0_37, %c0_38], %37 {strides = array<i32>} : memref<1x8x128xf32, #tpu.memory_space<vmem>>, vector<1x8x128xf32>,
    %c0_39 = arith.constant 0 : index
    %c0_40 = arith.constant 0 : index
    %c0_41 = arith.constant 0 : index
    %39 = vector.load %arg6[%c0_39, %c0_40, %c0_41] : memref<1x8x128xf32, #tpu.memory_space<vmem>>, vector<1x8x128xf32>
    %40 = vector.shape_cast %34 : vector<8x128xf32> to vector<1x8x128xf32>
    %41 = arith.addf %39, %40 : vector<1x8x128xf32>
    %c0_42 = arith.constant 0 : index
    %c0_43 = arith.constant 0 : index
    %c0_44 = arith.constant 0 : index
    %42 = vector.load %arg6[%c0_42, %c0_43, %c0_44] : memref<1x8x128xf32, #tpu.memory_space<vmem>>, vector<1x8x128xf32>
    tpu.vector_store %arg6[%c0_42, %c0_43, %c0_44], %41 {strides = array<i32>} : memref<1x8x128xf32, #tpu.memory_space<vmem>>, vector<1x8x128xf32>,
    return
  }
  func.func @transform_0(%arg0: i32, %arg1: i32) -> (i32, i32, i32, i32) {
    %c0_i32 = arith.constant 0 : i32
    %c0_i32_0 = arith.constant 0 : i32
    %c0_i32_1 = arith.constant 0 : i32
    return %arg0, %c0_i32, %arg1, %c0_i32_0 : i32, i32, i32, i32
  }
  func.func @transform_1(%arg0: i32, %arg1: i32) -> (i32, i32, i32, i32) {
    %c0_i32 = arith.constant 0 : i32
    %c0_i32_0 = arith.constant 0 : i32
    %c0_i32_1 = arith.constant 0 : i32
    return %arg0, %c0_i32, %arg1, %c0_i32_0 : i32, i32, i32, i32
  }
  func.func @transform_2(%arg0: i32, %arg1: i32) -> (i32, i32, i32) {
    %c0_i32 = arith.constant 0 : i32
    %c0_i32_0 = arith.constant 0 : i32
    return %arg0, %arg1, %c0_i32 : i32, i32, i32
  }
  func.func @transform_3(%arg0: i32, %arg1: i32) -> (i32, i32, i32) {
    %c0_i32 = arith.constant 0 : i32
    %c0_i32_0 = arith.constant 0 : i32
    %c0_i32_1 = arith.constant 0 : i32
    return %arg0, %c0_i32, %c0_i32_0 : i32, i32, i32
  }
  func.func @transform_4(%arg0: i32, %arg1: i32) -> (i32, i32, i32) {
    %c0_i32 = arith.constant 0 : i32
    %c0_i32_0 = arith.constant 0 : i32
    %c0_i32_1 = arith.constant 0 : i32
    return %arg0, %c0_i32, %c0_i32_0 : i32, i32, i32
  }
}

</mosaic_0001>

<bundles_post_ra>
// kernel: tpu_custom_call.1
= control target key start
LH: loop header
LB: loop body
LE: loop exit
PB: predicated region body
PF: predicated region fallthrough
CT: control target
= control target key end

     0   :  { %s1205_s0 = inlined_call_operand.hbm [shape: f32[2,4,8,128], index: 0, kind: input, shape index: {}]   ;;  %s1206_s1 = inlined_call_operand.hbm [shape: f32[2,4,8,128], index: 1, kind: input, shape index: {}]   ;;  %s1207_s2 = inlined_call_operand.hbm [shape: f32[2,8,128], index: 2, kind: input, shape index: {}]   ;;  %s1208_s3 = inlined_call_operand.hbm [shape: f32[2,8,128], index: 3, kind: output, shape index: {0}]   ;;  %s1209_s4 = inlined_call_operand.hbm [shape: f32[2,8,128], index: 4, kind: output, shape index: {1}]  }
   0x1   :  { %1222 = sst [smem:[#allocation21_spill]] %s1205_s0 }
   0x2   :  { %1223 = sst [smem:[#allocation22_spill]] %s1206_s1 }
   0x3   :  { %10 = vsyncpa [#allocation3], 0 }
   0x4   :  { %12 = vsyncpa [#allocation3 + $0x1], 0 }
   0x5   :  { %13 = vsyncpa [#allocation6], 0 }
   0x6   :  { %15 = vsyncpa [#allocation6 + $0x1], 0 }
   0x7   :  { %16 = vsyncpa [#allocation4], 0 }
   0x8   :  { %18 = vsyncpa [#allocation4 + $0x1], 0 }
   0x9   :  { %19 = vsyncpa [#allocation10], 0 }
   0xa   :  { %21 = vsyncpa [#allocation10 + $0x1], 0  ;;  %s905_s15 = smov 0   ;;  %s907_s16 = smov 0  }
   0xb   :  { %s909_s17 = smov 0   ;;  %s911_s18 = smov 0  }
   0xc   :  { %s913_s19 = smov 0   ;;  %s915_s20 = smov 0  }
   0xd LB: > { %1224 = sst [smem:[#allocation15_spill]] %s851_s15  ;;  %s936_s21 = sadd.s32 4294967295, %s871_s20   ;;  %s871_s20 = sphi %s915_s20, %s27_s20   ;;  %s867_s19 = sphi %s913_s19, %s1259_s19   ;;  %s863_s18 = sphi %s911_s18, %s1258_s18   ;;  %s859_s17 = sphi %s909_s17, %s1254_s17   ;;  %s855_s16 = sphi %s907_s16, %s1257_s16   ;;  %s851_s15 = sphi %s905_s15, %s1256_s15  }
   0xe   : > { %1225 = sst [smem:[#allocation16_spill]] %s859_s17  ;;  %s552_s22 = sadd.s32 4294967294, %s871_s20  }
   0xf   : > { %1226 = sst [smem:[#allocation17_spill]] %s871_s20  ;;  %s39_s23 = sadd.s32 1, %s867_s19 }
  0x10   : > { %s48_s24 = sadd.s32 1, %s859_s17  ;;  %p41_p0 = scmp.ge.s32.totalorder %s39_s23, 2 }
  0x11   : > { %p55_p1 = scmp.ne.s32.totalorder %s859_s17, %s855_s16  ;;  %p56_p2 = scmp.eq.s32.totalorder %s871_s20, 0 }
  0x12   : > { %p61_p3 = scmp.ne.s32.totalorder %s855_s16, %s851_s15  ;;  %s1261_s23 = smov (%p41_p0, %s39_s23), 0 }
  0x13   : > { %1227 = sst [smem:[#allocation18_spill]] %s1261_s23  ;;  %p948_p4 = por %p56_p2, %p55_p1 }
  0x14   : > { %p62_p5 = scmp.eq.s32.totalorder %s936_s21, 0  ;;  %s43_s26 = ssub.s32 %s867_s19, %s1261_s23 }
  0x15   : > { %p141_p6 = scmp.eq.s32.totalorder %s936_s21, 1  ;;  %p46_p7 = scmp.eq.s32.totalorder %s43_s26, 0 }
  0x16   : > { %p956_p8 = por %p62_p5, %p61_p3  ;;  %p147_p10 = scmp.eq.s32.totalorder %s552_s22, 1 }
  0x17   : > { %p960_p9 = por %p141_p6, %p55_p1  ;;  %p610_p13 = scmp.lt.s32.totalorder %s871_s20, 2 }
  0x18   : > { %s1229_s27 = scalar_select %p956_p8, 1, 0 }
  0x19   : > { %s1230_s28 = scalar_select %p960_p9, 1, 0 }
  0x1a   : > { %s965_s29 = scalar_select %p46_p7, %s859_s17, %s48_s24  }
  0x1b   : > { %p967_p11 = por %p147_p10, %p61_p3  ;;  %s974_s5 = sand.u32 1, %s859_s17  }
  0x1c   : > { %1231 = sst [smem:[#allocation19_spill]] %s965_s29  ;;  %s1210_s6 = sshll.u32 %s974_s5, 5 }
  0x1d   : > { %s1232_s30 = scalar_select %p967_p11, 1, 0 }
  0x1e   : > { %s581_s7 = sshll.u32 %s867_s19, 9  ;;  %p980_p0 = pnand %p610_p13, %p948_p4 }
  0x1f   : > { %1233 = sst [smem:[#allocation20_spill]] %s1232_s30  ;;  %s215_s9 = sand.u32 1, %s871_s20  }
  0x20   : > { %s1234_s8 = scalar_select %p980_p0, 1, 0 }
  0x21   : > { %s1235_s1 = sld [smem:[#allocation22_spill]]  ;;  %s219_s13 = scalar_lea.vmem [#allocation5], %s1210_s6 }
  0x22   : > { %s227_s14 = sshll.u32 %s219_s13, 4  ;;  %s998_s22 = scalar_lea.sflag [#allocation6], %s215_s9  ;;  %s995_s14 = int_to_ptr.vmem [resolvable:$true] %s227_s14 }
  0x23   : > { %p1004_p4 = pneg %p980_p0 }
  0x27   : > { %s990_s12 = scalar_lea.hbm %s1235_s1, %s581_s7  ;;  %s668_s11 = scalar_lea.hbm %s1235_s1, 1024 }
  0x28   : > { %s663_s24 = scalar_lea.hbm %s990_s12, 512  ;;  %p669_p7 = scmp.lt.u32.totalorder %s990_s12, %s1235_s1 }
  0x29   : > { %p664_p3 = scmp.ne.s32.totalorder %s990_s12, %s663_s24  ;;  %p670_p10 = scmp.lt.u32.totalorder %s668_s11, %s663_s24 }
  0x2a   : > { %p672_p12 = scmp.lt.u32.totalorder %s663_s24, %s990_s12 }
  0x2b   : > { %p666_p5 = pnand %p1004_p4, %p664_p3  ;;  %p671_p13 = por %p670_p10, %p669_p7 }
  0x2d   : > { %p667_p6 = pneg %p666_p5  ;;  %p673_p1 = por %p672_p12, %p671_p13 }
  0x2f   : > { %p674_p2 = pnand %p673_p1, %p667_p6 }
  0x31   : > { %677 = shalt.err (!%p674_p2)
}
  0x32   : > { %s678_s9 = scalar_lea.vmem %s995_s14, 512  ;;  %s873_s26 = smov [#allocation5]  }
  0x33   : > { %p679_p3 = scmp.ne.s32.totalorder %s995_s14, %s678_s9  ;;  %s683_s10 = sshll.u32 %s873_s26, 4  ;;  %s684_s10 = int_to_ptr.vmem [resolvable:$false] %s683_s10 }
  0x34   : > { %s685_s6 = scalar_lea.vmem %s684_s10, 1024  ;;  %p686_p9 = scmp.lt.s32.totalorder %s995_s14, %s684_s10 }
  0x35   : > { %p681_p5 = pnand %p679_p3, %p1004_p4  ;;  %p687_p8 = scmp.lt.s32.totalorder %s685_s6, %s678_s9 }
  0x37   : > { %p682_p11 = pneg %p681_p5  ;;  %p688_p7 = por %p687_p8, %p686_p9 }
  0x39   : > { %p689_p10 = pnand %p688_p7, %p682_p11 }
  0x3b   : > { %692 = shalt.err (!%p689_p10)
}
  0x3c   : > { %s1214_s24 = smov 128   ;;  %s1215_s11 = smov 8  }
  0x3d   : > { %599 = dma.hbm_to_vmem [thread:$0]  (!%p980_p0), %s990_s12, 512, %s995_s14, %s998_s22, %s1214_s24, %s1214_s24, %s1215_s11  }
  0x3e   : > { %p1237_p8 = scmp.lt.s32.totalorder %s871_s20, 3  ;;  %p1238_p9 = scmp.ge.s32.totalorder %s871_s20, 1 }
  0x3f   : > { %s1240_s0 = sld [smem:[#allocation21_spill]]  ;;  %s1241_s6 = sshll.u32 %s974_s5, 5 }
  0x40   : > { %p1035_p11 = pnand %p1238_p9, %p1237_p8  ;;  %s197_s1 = scalar_lea.vmem [#allocation2], %s1241_s6 }
  0x41   : > { %s205_s23 = sshll.u32 %s197_s1, 4  ;;  %s561_s12 = sshll.u32 %s974_s5, 3  ;;  %s1049_s23 = int_to_ptr.vmem [resolvable:$true] %s205_s23 }
  0x42   : > { %s1239_s13 = scalar_select %p1035_p11, 1, 0 }
  0x43   : > { %s194_s14 = scalar_lea.sflag [#allocation3], %s974_s5 }
  0x45   : > { %s1044_s10 = scalar_lea.hbm %s1240_s0, %s581_s7  ;;  %s698_s7 = scalar_lea.hbm %s1240_s0, 1024 }
  0x46   : > { %s693_s24 = scalar_lea.hbm %s1044_s10, 512  ;;  %p699_p6 = scmp.lt.u32.totalorder %s1044_s10, %s1240_s0 }
  0x47   : > { %p694_p12 = scmp.ne.s32.totalorder %s1044_s10, %s693_s24  ;;  %p700_p13 = scmp.lt.u32.totalorder %s698_s7, %s693_s24 }
  0x48   : > { %p702_p5 = scmp.lt.u32.totalorder %s693_s24, %s1044_s10 }
  0x49   : > { %p696_p1 = pnand %p694_p12, %p1004_p4  ;;  %p701_p3 = por %p700_p13, %p699_p6 }
  0x4b   : > { %p697_p2 = pneg %p696_p1  ;;  %p703_p7 = por %p702_p5, %p701_p3 }
  0x4d   : > { %p704_p10 = pnand %p703_p7, %p697_p2 }
  0x4f   : > { %707 = shalt.err (!%p704_p10)
}
  0x50   : > { %s708_s1 = scalar_lea.vmem %s1049_s23, 512  ;;  %s876_s11 = smov [#allocation2]  }
  0x51   : > { %p709_p8 = scmp.ne.s32.totalorder %s1049_s23, %s708_s1  ;;  %s713_s6 = sshll.u32 %s876_s11, 4  ;;  %s714_s6 = int_to_ptr.vmem [resolvable:$false] %s713_s6 }
  0x52   : > { %s715_s29 = scalar_lea.vmem %s714_s6, 1024  ;;  %p716_p1 = scmp.lt.s32.totalorder %s1049_s23, %s714_s6 }
  0x53   : > { %p711_p9 = pnand %p709_p8, %p1004_p4  ;;  %p717_p11 = scmp.lt.s32.totalorder %s715_s29, %s708_s1 }
  0x55   : > { %p712_p12 = pneg %p711_p9  ;;  %p718_p6 = por %p717_p11, %p716_p1 }
  0x57   : > { %p719_p13 = pnand %p718_p6, %p712_p12 }
  0x59   : > { %722 = shalt.err (!%p719_p13)
}
  0x5a   : > { %s1242_s24 = smov 8   ;;  %s1243_s9 = smov 128  }
  0x5b   : > { %596 = dma.hbm_to_vmem [thread:$0]  (!%p980_p0), %s1044_s10, 512, %s1049_s23, %s194_s14, %s1243_s9, %s1243_s9, %s1242_s24  }
  0x5c   : > { %s562_s7 = sshll.u32 %s867_s19, 7  ;;  %s241_s26 = scalar_lea.vmem [#allocation7], %s561_s12 }
  0x5d   : > { %s249_s1 = sshll.u32 %s241_s26, 4  ;;  %s247_s29 = scalar_lea.hbm %s1207_s2, %s562_s7  ;;  %s250_s1 = int_to_ptr.vmem [resolvable:$true] %s249_s1 }
  0x5e   : > { %s723_s0 = scalar_lea.hbm %s247_s29, 128  ;;  %s728_s30 = scalar_lea.hbm %s1207_s2, 256 }
  0x5f   : > { %p724_p11 = scmp.ne.s32.totalorder %s247_s29, %s723_s0  ;;  %p729_p5 = scmp.lt.u32.totalorder %s247_s29, %s1207_s2 }
  0x60   : > { %p730_p7 = scmp.lt.u32.totalorder %s728_s30, %s723_s0  ;;  %p732_p8 = scmp.lt.u32.totalorder %s723_s0, %s247_s29 }
  0x61   : > { %p726_p2 = pnand %p724_p11, %p1004_p4 }
  0x62   : > { %p731_p10 = por %p730_p7, %p729_p5 }
  0x63   : > { %p727_p3 = pneg %p726_p2 }
  0x64   : > { %p733_p9 = por %p732_p8, %p731_p10 }
  0x66   : > { %p734_p12 = pnand %p733_p9, %p727_p3 }
  0x68   : > { %737 = shalt.err (!%p734_p12)
}
  0x69   : > { %s738_s5 = scalar_lea.vmem %s250_s1, 128  ;;  %s877_s10 = smov [#allocation7]  }
  0x6a   : > { %p739_p1 = scmp.ne.s32.totalorder %s250_s1, %s738_s5  ;;  %s743_s12 = sshll.u32 %s877_s10, 4  ;;  %s744_s12 = int_to_ptr.vmem [resolvable:$false] %s743_s12 }
  0x6b   : > { %s745_s17 = scalar_lea.vmem %s744_s12, 256  ;;  %p746_p11 = scmp.lt.s32.totalorder %s250_s1, %s744_s12 }
  0x6c   : > { %p741_p6 = pnand %p739_p1, %p1004_p4  ;;  %p747_p2 = scmp.lt.s32.totalorder %s745_s17, %s738_s5 }
  0x6e   : > { %p742_p13 = pneg %p741_p6  ;;  %p748_p0 = por %p747_p2, %p746_p11 }
  0x70   : > { %p749_p5 = pnand %p748_p0, %p742_p13 }
  0x72   : > { %752 = shalt.err (!%p749_p5)
}
  0x73   : > { %p1244_p7 = scmp.ne.s32.totalorder %s1234_s8, 0  ;;  %p1245_p3 = scmp.ne.s32.totalorder %s1239_s13, 0 }
  0x74   : > { %s1100_s0 = sand.u32 (!%p1245_p3), 1, %s855_s16   ;;  %p1246_p4 = scmp.ne.s32.totalorder (!%p1245_p3), %s1229_s27, 0 }
  0x75   : > { %602 = dma.hbm_to_vmem [thread:$0]  (!%p1244_p7), %s247_s29, 128, %s250_s1, %s998_s22  }
  0x76   : > { %258 = sbr.rel (%p1245_p3) target bundleno = 180 (0xb4), region = 32  ;;  %s564_s15 = sshll.u32 (!%p1245_p3), %s1100_s0, 5 }
  0x77   : > { %s261_s20 = scalar_lea.sflag (!%p1245_p3), [#allocation3], %s1100_s0  ;;  %s264_s30 = scalar_lea.vmem (!%p1245_p3), [#allocation2], %s564_s15 }
  0x7d   : > { %834 = dma.done.wait (%p1246_p4), %s261_s20, 512  }
  0x7e   : > { %836 = vsyncadd (%p1246_p4), %s261_s20, 4294966784  ;;  %s269_s8 = sand.u32 1, %s936_s21   ;;  %s273_s25 = scalar_lea.vmem [#allocation5], %s564_s15 }
  0x7f   : > { %s270_s22 = scalar_lea.sflag [#allocation6], %s269_s8 }
  0x80   : > { %838 = dma.done.wait (%p1246_p4), %s270_s22, 640  }
  0x81   : > { %840 = vsyncadd (%p1246_p4), %s270_s22, 4294966656  ;;  %s1114_s13 = sshll.u32 %s1100_s0, 3  ;;  %v328_v1 = vld [vmem:[%s264_s30] sm:$0xff]  ;;  %s577_s24 = sshll.u32 %s863_s18, 7  ;;  %v569_v5 = vld [vmem:[%s264_s30 + $0x8] sm:$0xff] }
  0x82   : > { %s282_s14 = scalar_lea.vmem [#allocation7], %s1114_s13  ;;  %v329_v2 = vld [vmem:[%s273_s25] sm:$0xff]  ;;  %s321_s21 = scalar_lea.vmem [#allocation9], %s1114_s13  ;;  %v570_v6 = vld [vmem:[%s273_s25 + $0x8] sm:$0xff]  ;;  %v571_v7 = vld [vmem:[%s264_s30 + $0x10] sm:$0xff] }
  0x83   : > { %v349_v0 = vld [vmem:[%s282_s14] sm:$0xff]  ;;  %s393_s9 = sshll.u32 %s321_s21, 4  ;;  %v330_v4 = vsub.f32 %v328_v1, %v329_v2  ;;  %v335_v8 = vsub.f32 %v569_v5, %v570_v6  ;;  %v572_v9 = vld [vmem:[%s273_s25 + $0x10] sm:$0xff]  ;;  %v573_v10 = vld [vmem:[%s264_s30 + $0x18] sm:$0xff]  ;;  %s1124_s26 = scalar_lea.hbm %s1209_s4, %s577_s24  ;;  %s1126_s9 = int_to_ptr.vmem [resolvable:$true] %s393_s9 }
  0x84   : > { %v350_v3 = vand.u32 2147483647, %v349_v0  ;;  %v574_v11 = vld [vmem:[%s273_s25 + $0x18] sm:$0xff]  ;;  %v341_v12 = vsub.f32 %v571_v7, %v572_v9  ;;  %s367_s1 = scalar_lea.sflag [#allocation10], %s1100_s0  ;;  %s753_s11 = scalar_lea.vmem %s1126_s9, 128 }
  0x85   : > { %v336_v13 = vadd.f32 %v335_v8, %v330_v4  ;;  %v347_v14 = vsub.f32 %v573_v10, %v574_v11  ;;  %p754_p0 = scmp.ne.s32.totalorder %s1126_s9, %s753_s11  ;;  %p1247_p10 = scmp.ne.s32.totalorder %s1230_s28, 0 }
  0x86   : > { %360 = vst [vmem:[%s321_s21] sm:$0xff] %v350_v3  ;;  %s878_s6 = smov [#allocation9]  }
  0x87   : > { %v342_v15 = vadd.f32 %v341_v12, %v336_v13  ;;  %p755_p8 = pnand %p754_p0, %p1247_p10  ;;  %s757_s29 = sshll.u32 %s878_s6, 4  ;;  %s758_s29 = int_to_ptr.vmem [resolvable:$false] %s757_s29 }
  0x88   : > { %s759_s23 = scalar_lea.vmem %s758_s29, 256  ;;  %p760_p12 = scmp.lt.s32.totalorder %s1126_s9, %s758_s29 }
  0x89   : > { %p756_p9 = pneg %p755_p8  ;;  %p761_p1 = scmp.lt.s32.totalorder %s759_s23, %s753_s11 }
  0x8b   : > { %p762_p6 = por %p761_p1, %p760_p12 }
  0x8d   : > { %p763_p13 = pnand %p762_p6, %p756_p9 }
  0x8f   : > { %766 = shalt.err (!%p763_p13)
}
  0x90   : > { %s767_s5 = scalar_lea.hbm %s1124_s26, 128  ;;  %s771_s17 = scalar_lea.hbm %s1209_s4, 256 }
  0x91   : > { %p768_p11 = scmp.ne.s32.totalorder %s1124_s26, %s767_s5  ;;  %p772_p7 = scmp.lt.u32.totalorder %s1124_s26, %s1209_s4 }
  0x92   : > { %p773_p3 = scmp.lt.u32.totalorder %s771_s17, %s767_s5  ;;  %p775_p0 = scmp.lt.u32.totalorder %s767_s5, %s1124_s26 }
  0x93   : > { %p769_p2 = pnand %p768_p11, %p1247_p10 }
  0x94   : > { %p774_p4 = por %p773_p3, %p772_p7 }
  0x95   : > { %p770_p5 = pneg %p769_p2 }
  0x96   : > { %p776_p8 = por %p775_p0, %p774_p4 }
  0x98   : > { %p777_p9 = pnand %p776_p8, %p770_p5 }
  0x9a   : > { %780 = shalt.err (!%p777_p9)
}
  0x9b   : > { %590 = dma.vmem_to_hbm [thread:$0]  (%p1247_p10), %s1126_s9, 128, %s1124_s26, %s367_s1   ;;  %v348_v16 = vadd.f32 %v347_v14, %v342_v15 }
  0x9c   : > { %s314_s30 = scalar_lea.vmem [#allocation8], %s1114_s13  ;;  %s1156_s14 = scalar_lea.hbm %s1208_s3, %s577_s24 }
  0x9d   : > { %v351_v17 = vand.u32 2147483647, %v348_v16  ;;  %s380_s8 = sshll.u32 %s314_s30, 4  ;;  %s362_s21 = scalar_lea.sflag [#allocation4], %s1100_s0  ;;  %s1158_s8 = int_to_ptr.vmem [resolvable:$true] %s380_s8 }
  0x9e   : > { %s781_s27 = scalar_lea.vmem %s1158_s8, 128  ;;  %s879_s13 = smov [#allocation8]  }
  0x9f   : > { %v352_v18 = vmul.f32 %v351_v17, %v350_v3  ;;  %p782_p12 = scmp.ne.s32.totalorder %s1158_s8, %s781_s27  ;;  %s785_s9 = sshll.u32 %s879_s13, 4  ;;  %s786_s9 = int_to_ptr.vmem [resolvable:$false] %s785_s9 }
  0xa0   : > { %s787_s18 = scalar_lea.vmem %s786_s9, 256  ;;  %p788_p13 = scmp.lt.s32.totalorder %s1158_s8, %s786_s9 }
  0xa1   : > { %357 = vst [vmem:[%s314_s30] sm:$0xff] %v352_v18  ;;  %p783_p1 = pnand %p782_p12, %p1247_p10  ;;  %p789_p11 = scmp.lt.s32.totalorder %s787_s18, %s781_s27 }
  0xa3   : > { %p784_p6 = pneg %p783_p1  ;;  %p790_p2 = por %p789_p11, %p788_p13 }
  0xa5   : > { %p791_p5 = pnand %p790_p2, %p784_p6 }
  0xa7   : > { %794 = shalt.err (!%p791_p5)
}
  0xa8   : > { %s795_s0 = scalar_lea.hbm %s1156_s14, 128  ;;  %s799_s26 = scalar_lea.hbm %s1208_s3, 256 }
  0xa9   : > { %p796_p7 = scmp.ne.s32.totalorder %s1156_s14, %s795_s0  ;;  %p800_p0 = scmp.lt.u32.totalorder %s1156_s14, %s1208_s3 }
  0xaa   : > { %p801_p8 = scmp.lt.u32.totalorder %s799_s26, %s795_s0  ;;  %p803_p12 = scmp.lt.u32.totalorder %s795_s0, %s1156_s14 }
  0xab   : > { %p797_p3 = pnand %p796_p7, %p1247_p10 }
  0xac   : > { %p802_p9 = por %p801_p8, %p800_p0 }
  0xad   : > { %p798_p4 = pneg %p797_p3 }
  0xae   : > { %p804_p1 = por %p803_p12, %p802_p9 }
  0xb0   : > { %p805_p6 = pnand %p804_p1, %p798_p4 }
  0xb2   : > { %808 = shalt.err (!%p805_p6)
}
  0xb3   : > { %589 = dma.vmem_to_hbm [thread:$0]  (%p1247_p10), %s1158_s8, 128, %s1156_s14, %s362_s21  }
  0xb4 PF: > { %s1248_s6 = sld [smem:[#allocation15_spill]]  ;;  %s1249_s29 = sld [smem:[#allocation20_spill]] }
  0xb5   : > { %s1250_s23 = sld [smem:[#allocation17_spill]] }
  0xba   : > { %s405_s5 = sand.u32 1, %s1248_s6   ;;  %p1251_p13 = scmp.ne.s32.totalorder %s1249_s29, 0 }
  0xbb   : > { %p1252_p11 = scmp.ge.s32.totalorder %s1250_s23, 2  ;;  %s406_s10 = scalar_lea.sflag [#allocation4], %s405_s5 }
  0xbd   : > { %p604_p2 = pnand %p1252_p11, %p1251_p13 }
  0xbf   : > { %842 = dma.done.wait (!%p604_p2), %s406_s10, 128  }
  0xc0   : > { %844 = vsyncadd (!%p604_p2), %s406_s10, 4294967168  ;;  %s415_s12 = scalar_lea.sflag [#allocation10], %s405_s5 }
  0xc1   : > { %846 = dma.done.wait (!%p604_p2), %s415_s12, 128  }
  0xc2   : > { %848 = vsyncadd (!%p604_p2), %s415_s12, 4294967168  ;;  %s27_s20 = sadd.s32 1, %s1250_s23   ;;  %s1253_s28 = sld [smem:[#allocation16_spill]] }
  0xc3   : > { %p24_p5 = scmp.ge.s32.totalorder %s27_s20, 4   ;;  %s1254_s17 = sld [smem:[#allocation19_spill]] }
  0xc4   : > { %s1255_s30 = sld [smem:[#allocation18_spill]]  ;;  %s1256_s15 = smov %s855_s16 }
  0xc5   : > { %s1258_s18 = smov %s867_s19  ;;  %26 = sbr.rel (!%p24_p5) target bundleno = 13 (0xd), region = 128 }
  0xc8   : > { %s1257_s16 = smov %s1253_s28 }
  0xca   : > { %s1259_s19 = smov %s1255_s30 }
  0xcc   :  { %420 = vsyncpa [#allocation3], 1 }
  0xcd   :  { %422 = vsyncpa [#allocation3 + $0x1], 1 }
  0xce   :  { %423 = vsyncpa [#allocation6], 1 }
  0xcf   :  { %425 = vsyncpa [#allocation6 + $0x1], 1 }
  0xd0   :  { %426 = vsyncpa [#allocation4], 1 }
  0xd1   :  { %428 = vsyncpa [#allocation4 + $0x1], 1 }
  0xd2   :  { %429 = vsyncpa [#allocation10], 1 }
  0xd3   :  { %431 = vsyncpa [#allocation10 + $0x1], 1 }

</bundles_post_ra>
